<compile_context>
chip_gen: v7x
topology: tpu7x:2x2x1
jax: 0.10.0
libtpu: 0.0.40
codegen_flags: <defaults>
</compile_context>

<pallas_src>
import jax
import jax.numpy as jnp
from jax import lax
from jax.experimental import pallas as pl
from jax.experimental.pallas import tpu as pltpu

LATENT = 64
HID = 128
HALF = LATENT // 2          # 32

D_INERTIAL = 201 * 3        # 603
D_LEG = 25 * 36             # 900
D_FEET = 25 * 20            # 500

# Lane-aligned padded feature dims.
D_I_PAD = 640
D_L_PAD = 1024
D_F_PAD = 512

# Batch tile: fills the MXU M dimension and, with double-buffered bf16 input
# tiles (~4.3 MiB per tile set), stays well inside every generation's scoped
# VMEM (16/32/32 MiB defaults).
TB_MAX = 512


def _round_up(x, m):
    return (x + m - 1) // m * m


def _mish(x):
    # mish(x) = x * tanh(softplus(x)) = x * (t^2 + 2t) / (t^2 + 2t + 2), t = e^x
    # PyTorch softplus uses a linear branch for x > 20 (so mish(x) ~= x there).
    xs = jnp.minimum(x, 20.0)
    t = jnp.exp(xs)
    u = t * (t + 2.0)
    ratio = u * pl.reciprocal(u + 2.0, approx=True)
    return jnp.where(x > 20.0, x, x * ratio)


def ipt_encoder_kernel(xi_ref, xl_ref, xf_ref,
                       wi1_ref, wl1_ref, wf1_ref, b1_ref,
                       w2_ref, b2_ref, wc1_ref, bc1_ref, wc2_ref, bc2_ref,
                       out_ref):
    f32 = jnp.float32
    bf16 = jnp.bfloat16

    # First-layer projections (bf16 on the MXU, f32 accumulate).
    hi = jnp.dot(xi_ref[...], wi1_ref[...], preferred_element_type=f32)
    hl = jnp.dot(xl_ref[...], wl1_ref[...], preferred_element_type=f32)
    hf = jnp.dot(xf_ref[...], wf1_ref[...], preferred_element_type=f32)
    h = _mish(jnp.concatenate([hi, hl, hf], axis=-1) + b1_ref[...])   # (TB, 384) f32
    # nn.Dropout is identity in eval/inference mode.

    # Fused second layer: block-diagonal (384, 96) weight produces
    # concat([zi, zl, zf], axis=-1) in one lane-dense matmul.
    z = jnp.dot(h.astype(bf16), w2_ref[...], preferred_element_type=f32) + b2_ref[...]

    # Head MLP: Linear(96 -> 64) + Mish + Linear(64 -> 64).
    hc = _mish(jnp.dot(z.astype(bf16), wc1_ref[...], preferred_element_type=f32)
               + bc1_ref[...])
    feat = jnp.dot(hc.astype(bf16), wc2_ref[...], preferred_element_type=f32) + bc2_ref[...]

    # F.normalize(feat, dim=-1): x / max(||x||, 1e-12) == x * rsqrt(max(||x||^2, 1e-24))
    sumsq = jnp.sum(feat * feat, axis=-1, keepdims=True)
    out_ref[...] = feat * lax.rsqrt(jnp.maximum(sumsq, 1e-24))


def init_params(key):
    """Deterministic synthetic parameters.

    Linear weights are stored as (in_features, out_features) so y = x @ W + b
    (transpose of PyTorch's nn.Linear.weight); biases are (1, out_features).
    """
    keys = jax.random.split(key, 8)

    def lin(k, fan_in, fan_out):
        kw, kb = jax.random.split(k)
        bound = 1.0 / jnp.sqrt(fan_in)
        w = jax.random.uniform(kw, (fan_in, fan_out), jnp.float32, -bound, bound)
        b = jax.random.uniform(kb, (1, fan_out), jnp.float32, -bound, bound)
        return w, b

    wi1, bi1 = lin(keys[0], D_INERTIAL, HID)
    wi2, bi2 = lin(keys[1], HID, HALF)
    wl1, bl1 = lin(keys[2], D_LEG, HID)
    wl2, bl2 = lin(keys[3], HID, HALF)
    wf1, bf1 = lin(keys[4], D_FEET, HID)
    wf2, bf2 = lin(keys[5], HID, HALF)
    wc1, bc1 = lin(keys[6], 3 * HALF, LATENT)
    wc2, bc2 = lin(keys[7], LATENT, LATENT)
    return (wi1, bi1, wi2, bi2,
            wl1, bl1, wl2, bl2,
            wf1, bf1, wf2, bf2,
            wc1, bc1, wc2, bc2)


def prepare_params(params):
    """Pad / fuse / cast the natural-layout params into kernel-ready form."""
    (wi1, bi1, wi2, bi2,
     wl1, bl1, wl2, bl2,
     wf1, bf1, wf2, bf2,
     wc1, bc1, wc2, bc2) = params

    def pad_k(w, k_pad):
        k, _ = w.shape
        return jnp.pad(w, ((0, k_pad - k), (0, 0)))

    bf16 = jnp.bfloat16
    wi1p = pad_k(wi1, D_I_PAD).astype(bf16)
    wl1p = pad_k(wl1, D_L_PAD).astype(bf16)
    wf1p = pad_k(wf1, D_F_PAD).astype(bf16)
    b1 = jnp.concatenate([bi1, bl1, bf1], axis=-1)                 # (1, 384) f32

    # Block-diagonal fused second-layer weight: (3*HID, 3*HALF).
    w2 = jnp.zeros((3 * HID, 3 * HALF), jnp.float32)
    w2 = w2.at[0:HID, 0:HALF].set(wi2)
    w2 = w2.at[HID:2 * HID, HALF:2 * HALF].set(wl2)
    w2 = w2.at[2 * HID:3 * HID, 2 * HALF:3 * HALF].set(wf2)
    b2 = jnp.concatenate([bi2, bl2, bf2], axis=-1)                 # (1, 96) f32

    return (wi1p, wl1p, wf1p, b1,
            w2.astype(bf16), b2,
            wc1.astype(bf16), bc1,
            wc2.astype(bf16), bc2)


def ipt_encoder(inertial, leg, feet, kparams):
    B = inertial.shape[0]
    b8 = _round_up(B, 8)
    if b8 <= TB_MAX:
        tb, bp = b8, b8
    else:
        tb, bp = TB_MAX, _round_up(B, TB_MAX)
    nb = bp // tb

    def prep(x, d_raw, d_pad):
        x = x.reshape(B, -1).astype(jnp.float32)
        x = jnp.pad(x, ((0, bp - B), (0, d_pad - d_raw)))
        return x.astype(jnp.bfloat16)

    x_i = prep(inertial, D_INERTIAL, D_I_PAD)
    x_l = prep(leg, D_LEG, D_L_PAD)
    x_f = prep(feet, D_FEET, D_F_PAD)

    args = (x_i, x_l, x_f) + tuple(kparams)

    def xspec(d):
        return pl.BlockSpec((tb, d), lambda i: (i, 0))

    def const_spec(a):
        return pl.BlockSpec(a.shape, lambda i: (0, 0))

    in_specs = [xspec(D_I_PAD), xspec(D_L_PAD), xspec(D_F_PAD)]
    in_specs += [const_spec(a) for a in kparams]
    out_spec = pl.BlockSpec((tb, LATENT), lambda i: (i, 0))

    # Advisory cost hint for the XLA scheduler.
    flops = 2 * bp * (D_INERTIAL * HID + D_LEG * HID + D_FEET * HID
                      + 3 * HID * 3 * HALF + 3 * HALF * LATENT + LATENT * LATENT)
    transcendentals = bp * (2 * (3 * HID + LATENT) + 1)
    bytes_accessed = (sum(int(a.size) * a.dtype.itemsize for a in args)
                      + bp * LATENT * 4)

    out = pl.pallas_call(
        ipt_encoder_kernel,
        out_shape=jax.ShapeDtypeStruct((bp, LATENT), jnp.float32),
        grid=(nb,),
        in_specs=in_specs,
        out_specs=out_spec,
        compiler_params=pltpu.CompilerParams(
            dimension_semantics=("parallel",),
            vmem_limit_bytes=32 * 1024 * 1024),
        cost_estimate=pl.CostEstimate(flops=flops,
                                      transcendentals=transcendentals,
                                      bytes_accessed=bytes_accessed),
    )(*args)
    return out[:B]


def ipt_encoder_ref(inertial, leg, feet, params):
    """Pure-JAX f32 reference matching the PyTorch module (eval mode)."""
    (wi1, bi1, wi2, bi2,
     wl1, bl1, wl2, bl2,
     wf1, bf1, wf2, bf2,
     wc1, bc1, wc2, bc2) = params

    def mish(x):
        return x * jnp.tanh(jnp.logaddexp(x, 0.0))

    def branch(x, w1, b1, w2, b2):
        return mish(x @ w1 + b1) @ w2 + b2

    B = inertial.shape[0]
    zi = branch(inertial.reshape(B, -1), wi1, bi1, wi2, bi2)
    zl = branch(leg.reshape(B, -1), wl1, bl1, wl2, bl2)
    zf = branch(feet.reshape(B, -1), wf1, bf1, wf2, bf2)
    z = jnp.concatenate([zi, zl, zf], axis=-1)
    feat = mish(z @ wc1 + bc1) @ wc2 + bc2
    n = jnp.linalg.norm(feat, axis=-1, keepdims=True)
    return feat / jnp.maximum(n, 1e-12)


if __name__ == "__main__":
    key = jax.random.PRNGKey(0)
    k_in, k_leg, k_feet, k_params = jax.random.split(key, 4)

    B = 2
    inertial = jax.random.normal(k_in, (B, 201, 3), jnp.float32)
    leg = jax.random.normal(k_leg, (B, 25, 36), jnp.float32)
    feet = jax.random.normal(k_feet, (B, 25, 20), jnp.float32)

    params = init_params(k_params)
    kparams = prepare_params(params)

    out = jax.block_until_ready(ipt_encoder(inertial, leg, feet, kparams))

    assert out.shape == (B, LATENT), out.shape
    # Rows must be L2-normalized.
    norms = jnp.linalg.norm(out, axis=-1)
    assert jnp.allclose(norms, 1.0, atol=2e-3), norms
    # bf16 matmuls + approx-reciprocal Mish => loose tolerance vs f32 reference.
    ref = ipt_encoder_ref(inertial, leg, feet, params)
    assert jnp.max(jnp.abs(out - ref)) < 0.1, jnp.max(jnp.abs(out - ref))

    print("KERNEL_OK")
</pallas_src>

<mosaic_0001>
module attributes {stable_mosaic.version = 11 : i64} {
  func.func @ipt_encoder_kernel(%arg0: i32, %arg1: memref<8x640xbf16, #tpu.memory_space<vmem>>, %arg2: memref<8x1024xbf16, #tpu.memory_space<vmem>>, %arg3: memref<8x512xbf16, #tpu.memory_space<vmem>>, %arg4: memref<640x128xbf16, #tpu.memory_space<vmem>>, %arg5: memref<1024x128xbf16, #tpu.memory_space<vmem>>, %arg6: memref<512x128xbf16, #tpu.memory_space<vmem>>, %arg7: memref<1x384xf32, #tpu.memory_space<vmem>>, %arg8: memref<384x96xbf16, #tpu.memory_space<vmem>>, %arg9: memref<1x96xf32, #tpu.memory_space<vmem>>, %arg10: memref<96x64xbf16, #tpu.memory_space<vmem>>, %arg11: memref<1x64xf32, #tpu.memory_space<vmem>>, %arg12: memref<64x64xbf16, #tpu.memory_space<vmem>>, %arg13: memref<1x64xf32, #tpu.memory_space<vmem>>, %arg14: memref<8x64xf32, #tpu.memory_space<vmem>>) attributes {dimension_semantics = [#tpu.dimension_semantics<parallel>], iteration_bounds = array<i64: 1>, scalar_prefetch = 0 : i64, scratch_operands = 0 : i64, tpu.core_type = #tpu.core_type<tc>, window_params = [{transform_indices = @transform_0, window_bounds = array<i64: 8, 640>}, {transform_indices = @transform_1, window_bounds = array<i64: 8, 1024>}, {transform_indices = @transform_2, window_bounds = array<i64: 8, 512>}, {pipeline_mode = #tpu.pipeline_mode<synchronous>, transform_indices = @transform_3, window_bounds = array<i64: 640, 128>}, {pipeline_mode = #tpu.pipeline_mode<synchronous>, transform_indices = @transform_4, window_bounds = array<i64: 1024, 128>}, {pipeline_mode = #tpu.pipeline_mode<synchronous>, transform_indices = @transform_5, window_bounds = array<i64: 512, 128>}, {pipeline_mode = #tpu.pipeline_mode<synchronous>, transform_indices = @transform_6, window_bounds = array<i64: 1, 384>}, {pipeline_mode = #tpu.pipeline_mode<synchronous>, transform_indices = @transform_7, window_bounds = array<i64: 384, 96>}, {pipeline_mode = #tpu.pipeline_mode<synchronous>, transform_indices = @transform_8, window_bounds = array<i64: 1, 96>}, {pipeline_mode = #tpu.pipeline_mode<synchronous>, transform_indices = @transform_9, window_bounds = array<i64: 96, 64>}, {pipeline_mode = #tpu.pipeline_mode<synchronous>, transform_indices = @transform_10, window_bounds = array<i64: 1, 64>}, {pipeline_mode = #tpu.pipeline_mode<synchronous>, transform_indices = @transform_11, window_bounds = array<i64: 64, 64>}, {pipeline_mode = #tpu.pipeline_mode<synchronous>, transform_indices = @transform_12, window_bounds = array<i64: 1, 64>}, {transform_indices = @transform_13, window_bounds = array<i64: 8, 64>}]} {
    %c0 = arith.constant 0 : index
    %c0_0 = arith.constant 0 : index
    %0 = vector.load %arg1[%c0, %c0_0] : memref<8x640xbf16, #tpu.memory_space<vmem>>, vector<8x640xbf16>
    %c0_1 = arith.constant 0 : index
    %c0_2 = arith.constant 0 : index
    %1 = vector.load %arg4[%c0_1, %c0_2] : memref<640x128xbf16, #tpu.memory_space<vmem>>, vector<640x128xbf16>
    %cst = arith.constant dense<0.000000e+00> : vector<8x128xf32>
    %2 = tpu.matmul %0, %1, %cst {dimension_numbers = #tpu.dot_dimension_numbers<[1], [0], [0], [1], [0, 0, 1, 1], [], []>} : vector<8x640xbf16>, vector<640x128xbf16>, vector<8x128xf32> -> vector<8x128xf32>
    %c0_3 = arith.constant 0 : index
    %c0_4 = arith.constant 0 : index
    %3 = vector.load %arg2[%c0_3, %c0_4] : memref<8x1024xbf16, #tpu.memory_space<vmem>>, vector<8x1024xbf16>
    %c0_5 = arith.constant 0 : index
    %c0_6 = arith.constant 0 : index
    %4 = vector.load %arg5[%c0_5, %c0_6] : memref<1024x128xbf16, #tpu.memory_space<vmem>>, vector<1024x128xbf16>
    %cst_7 = arith.constant dense<0.000000e+00> : vector<8x128xf32>
    %5 = tpu.matmul %3, %4, %cst_7 {dimension_numbers = #tpu.dot_dimension_numbers<[1], [0], [0], [1], [0, 0, 1, 1], [], []>} : vector<8x1024xbf16>, vector<1024x128xbf16>, vector<8x128xf32> -> vector<8x128xf32>
    %c0_8 = arith.constant 0 : index
    %c0_9 = arith.constant 0 : index
    %6 = vector.load %arg3[%c0_8, %c0_9] : memref<8x512xbf16, #tpu.memory_space<vmem>>, vector<8x512xbf16>
    %c0_10 = arith.constant 0 : index
    %c0_11 = arith.constant 0 : index
    %7 = vector.load %arg6[%c0_10, %c0_11] : memref<512x128xbf16, #tpu.memory_space<vmem>>, vector<512x128xbf16>
    %cst_12 = arith.constant dense<0.000000e+00> : vector<8x128xf32>
    %8 = tpu.matmul %6, %7, %cst_12 {dimension_numbers = #tpu.dot_dimension_numbers<[1], [0], [0], [1], [0, 0, 1, 1], [], []>} : vector<8x512xbf16>, vector<512x128xbf16>, vector<8x128xf32> -> vector<8x128xf32>
    %9 = tpu.concatenate %2, %5, %8 in 1 : vector<8x128xf32>, vector<8x128xf32>, vector<8x128xf32> -> vector<8x384xf32>
    %c0_13 = arith.constant 0 : index
    %c0_14 = arith.constant 0 : index
    %10 = vector.load %arg7[%c0_13, %c0_14] : memref<1x384xf32, #tpu.memory_space<vmem>>, vector<1x384xf32>
    %11 = vector.broadcast %10 : vector<1x384xf32> to vector<8x384xf32>
    %12 = arith.addf %9, %11 : vector<8x384xf32>
    %cst_15 = arith.constant 2.000000e+01 : f32
    %13 = vector.broadcast %cst_15 : f32 to vector<8x384xf32>
    %14 = arith.minimumf %12, %13 : vector<8x384xf32>
    %15 = math.exp %14 : vector<8x384xf32>
    %cst_16 = arith.constant 2.000000e+00 : f32
    %16 = vector.broadcast %cst_16 : f32 to vector<8x384xf32>
    %17 = arith.addf %15, %16 : vector<8x384xf32>
    %18 = arith.mulf %15, %17 : vector<8x384xf32>
    %cst_17 = arith.constant 2.000000e+00 : f32
    %19 = vector.broadcast %cst_17 : f32 to vector<8x384xf32>
    %20 = arith.addf %18, %19 : vector<8x384xf32>
    %21 = tpu.reciprocal %20 {approx = true} : vector<8x384xf32> -> vector<8x384xf32>
    %22 = arith.mulf %18, %21 : vector<8x384xf32>
    %cst_18 = arith.constant 2.000000e+01 : f32
    %23 = vector.broadcast %cst_18 : f32 to vector<8x384xf32>
    %24 = arith.cmpf ogt, %12, %23 : vector<8x384xf32>
    %25 = arith.mulf %12, %22 : vector<8x384xf32>
    %26 = arith.select %24, %12, %25 : vector<8x384xi1>, vector<8x384xf32>
    %27 = arith.truncf %26 : vector<8x384xf32> to vector<8x384xbf16>
    %c0_19 = arith.constant 0 : index
    %c0_20 = arith.constant 0 : index
    %28 = vector.load %arg8[%c0_19, %c0_20] : memref<384x96xbf16, #tpu.memory_space<vmem>>, vector<384x96xbf16>
    %cst_21 = arith.constant dense<0.000000e+00> : vector<8x96xf32>
    %29 = tpu.matmul %27, %28, %cst_21 {dimension_numbers = #tpu.dot_dimension_numbers<[1], [0], [0], [1], [0, 0, 1, 1], [], []>} : vector<8x384xbf16>, vector<384x96xbf16>, vector<8x96xf32> -> vector<8x96xf32>
    %c0_22 = arith.constant 0 : index
    %c0_23 = arith.constant 0 : index
    %30 = vector.load %arg9[%c0_22, %c0_23] : memref<1x96xf32, #tpu.memory_space<vmem>>, vector<1x96xf32>
    %31 = vector.broadcast %30 : vector<1x96xf32> to vector<8x96xf32>
    %32 = arith.addf %29, %31 : vector<8x96xf32>
    %33 = arith.truncf %32 : vector<8x96xf32> to vector<8x96xbf16>
    %c0_24 = arith.constant 0 : index
    %c0_25 = arith.constant 0 : index
    %34 = vector.load %arg10[%c0_24, %c0_25] : memref<96x64xbf16, #tpu.memory_space<vmem>>, vector<96x64xbf16>
    %cst_26 = arith.constant dense<0.000000e+00> : vector<8x64xf32>
    %35 = tpu.matmul %33, %34, %cst_26 {dimension_numbers = #tpu.dot_dimension_numbers<[1], [0], [0], [1], [0, 0, 1, 1], [], []>} : vector<8x96xbf16>, vector<96x64xbf16>, vector<8x64xf32> -> vector<8x64xf32>
    %c0_27 = arith.constant 0 : index
    %c0_28 = arith.constant 0 : index
    %36 = vector.load %arg11[%c0_27, %c0_28] : memref<1x64xf32, #tpu.memory_space<vmem>>, vector<1x64xf32>
    %37 = vector.broadcast %36 : vector<1x64xf32> to vector<8x64xf32>
    %38 = arith.addf %35, %37 : vector<8x64xf32>
    %cst_29 = arith.constant 2.000000e+01 : f32
    %39 = vector.broadcast %cst_29 : f32 to vector<8x64xf32>
    %40 = arith.minimumf %38, %39 : vector<8x64xf32>
    %41 = math.exp %40 : vector<8x64xf32>
    %cst_30 = arith.constant 2.000000e+00 : f32
    %42 = vector.broadcast %cst_30 : f32 to vector<8x64xf32>
    %43 = arith.addf %41, %42 : vector<8x64xf32>
    %44 = arith.mulf %41, %43 : vector<8x64xf32>
    %cst_31 = arith.constant 2.000000e+00 : f32
    %45 = vector.broadcast %cst_31 : f32 to vector<8x64xf32>
    %46 = arith.addf %44, %45 : vector<8x64xf32>
    %47 = tpu.reciprocal %46 {approx = true} : vector<8x64xf32> -> vector<8x64xf32>
    %48 = arith.mulf %44, %47 : vector<8x64xf32>
    %cst_32 = arith.constant 2.000000e+01 : f32
    %49 = vector.broadcast %cst_32 : f32 to vector<8x64xf32>
    %50 = arith.cmpf ogt, %38, %49 : vector<8x64xf32>
    %51 = arith.mulf %38, %48 : vector<8x64xf32>
    %52 = arith.select %50, %38, %51 : vector<8x64xi1>, vector<8x64xf32>
    %53 = arith.truncf %52 : vector<8x64xf32> to vector<8x64xbf16>
    %c0_33 = arith.constant 0 : index
    %c0_34 = arith.constant 0 : index
    %54 = vector.load %arg12[%c0_33, %c0_34] : memref<64x64xbf16, #tpu.memory_space<vmem>>, vector<64x64xbf16>
    %cst_35 = arith.constant dense<0.000000e+00> : vector<8x64xf32>
    %55 = tpu.matmul %53, %54, %cst_35 {dimension_numbers = #tpu.dot_dimension_numbers<[1], [0], [0], [1], [0, 0, 1, 1], [], []>} : vector<8x64xbf16>, vector<64x64xbf16>, vector<8x64xf32> -> vector<8x64xf32>
    %c0_36 = arith.constant 0 : index
    %c0_37 = arith.constant 0 : index
    %56 = vector.load %arg13[%c0_36, %c0_37] : memref<1x64xf32, #tpu.memory_space<vmem>>, vector<1x64xf32>
    %57 = vector.broadcast %56 : vector<1x64xf32> to vector<8x64xf32>
    %58 = arith.addf %55, %57 : vector<8x64xf32>
    %59 = arith.mulf %58, %58 : vector<8x64xf32>
    %cst_38 = arith.constant dense<0.000000e+00> : vector<8xf32>
    %60 = vector.multi_reduction <add>, %59, %cst_38 [1] : vector<8x64xf32> to vector<8xf32>
    %61 = vector.shape_cast %60 : vector<8xf32> to vector<8x1xf32>
    %cst_39 = arith.constant 1.000000e-24 : f32
    %62 = vector.broadcast %cst_39 : f32 to vector<8x1xf32>
    %63 = arith.maximumf %61, %62 : vector<8x1xf32>
    %64 = math.rsqrt %63 : vector<8x1xf32>
    %65 = vector.broadcast %64 : vector<8x1xf32> to vector<8x64xf32>
    %66 = arith.mulf %58, %65 : vector<8x64xf32>
    %c0_40 = arith.constant 0 : index
    %c0_41 = arith.constant 0 : index
    %67 = vector.load %arg14[%c0_40, %c0_41] : memref<8x64xf32, #tpu.memory_space<vmem>>, vector<8x64xf32>
    tpu.vector_store %arg14[%c0_40, %c0_41], %66 {strides = array<i32>} : memref<8x64xf32, #tpu.memory_space<vmem>>, vector<8x64xf32>,
    return
  }
  func.func @transform_0(%arg0: i32) -> (i32, i32) {
    %c0_i32 = arith.constant 0 : i32
    %c0_i32_0 = arith.constant 0 : i32
    return %arg0, %c0_i32 : i32, i32
  }
  func.func @transform_1(%arg0: i32) -> (i32, i32) {
    %c0_i32 = arith.constant 0 : i32
    %c0_i32_0 = arith.constant 0 : i32
    return %arg0, %c0_i32 : i32, i32
  }
  func.func @transform_2(%arg0: i32) -> (i32, i32) {
    %c0_i32 = arith.constant 0 : i32
    %c0_i32_0 = arith.constant 0 : i32
    return %arg0, %c0_i32 : i32, i32
  }
  func.func @transform_3(%arg0: i32) -> (i32, i32) {
    %c0_i32 = arith.constant 0 : i32
    %c0_i32_0 = arith.constant 0 : i32
    %c0_i32_1 = arith.constant 0 : i32
    return %c0_i32, %c0_i32_0 : i32, i32
  }
  func.func @transform_4(%arg0: i32) -> (i32, i32) {
    %c0_i32 = arith.constant 0 : i32
    %c0_i32_0 = arith.constant 0 : i32
    %c0_i32_1 = arith.constant 0 : i32
    return %c0_i32, %c0_i32_0 : i32, i32
  }
  func.func @transform_5(%arg0: i32) -> (i32, i32) {
    %c0_i32 = arith.constant 0 : i32
    %c0_i32_0 = arith.constant 0 : i32
    %c0_i32_1 = arith.constant 0 : i32
    return %c0_i32, %c0_i32_0 : i32, i32
  }
  func.func @transform_6(%arg0: i32) -> (i32, i32) {
    %c0_i32 = arith.constant 0 : i32
    %c0_i32_0 = arith.constant 0 : i32
    %c0_i32_1 = arith.constant 0 : i32
    return %c0_i32, %c0_i32_0 : i32, i32
  }
  func.func @transform_7(%arg0: i32) -> (i32, i32) {
    %c0_i32 = arith.constant 0 : i32
    %c0_i32_0 = arith.constant 0 : i32
    %c0_i32_1 = arith.constant 0 : i32
    return %c0_i32, %c0_i32_0 : i32, i32
  }
  func.func @transform_8(%arg0: i32) -> (i32, i32) {
    %c0_i32 = arith.constant 0 : i32
    %c0_i32_0 = arith.constant 0 : i32
    %c0_i32_1 = arith.constant 0 : i32
    return %c0_i32, %c0_i32_0 : i32, i32
  }
  func.func @transform_9(%arg0: i32) -> (i32, i32) {
    %c0_i32 = arith.constant 0 : i32
    %c0_i32_0 = arith.constant 0 : i32
    %c0_i32_1 = arith.constant 0 : i32
    return %c0_i32, %c0_i32_0 : i32, i32
  }
  func.func @transform_10(%arg0: i32) -> (i32, i32) {
    %c0_i32 = arith.constant 0 : i32
    %c0_i32_0 = arith.constant 0 : i32
    %c0_i32_1 = arith.constant 0 : i32
    return %c0_i32, %c0_i32_0 : i32, i32
  }
  func.func @transform_11(%arg0: i32) -> (i32, i32) {
    %c0_i32 = arith.constant 0 : i32
    %c0_i32_0 = arith.constant 0 : i32
    %c0_i32_1 = arith.constant 0 : i32
    return %c0_i32, %c0_i32_0 : i32, i32
  }
  func.func @transform_12(%arg0: i32) -> (i32, i32) {
    %c0_i32 = arith.constant 0 : i32
    %c0_i32_0 = arith.constant 0 : i32
    %c0_i32_1 = arith.constant 0 : i32
    return %c0_i32, %c0_i32_0 : i32, i32
  }
  func.func @transform_13(%arg0: i32) -> (i32, i32) {
    %c0_i32 = arith.constant 0 : i32
    %c0_i32_0 = arith.constant 0 : i32
    return %arg0, %c0_i32 : i32, i32
  }
}

</mosaic_0001>

<bundles_post_ra>
// kernel: tpu_custom_call.1
= control target key start
LH: loop header
LB: loop body
LE: loop exit
PB: predicated region body
PF: predicated region fallthrough
CT: control target
= control target key end

     0   :  { %18 = vsyncpa [#allocation3], 0  ;;  %s3375_s0 = inlined_call_operand.vmem [shape: bf16[8,640], index: 0, kind: input, shape index: {}]   ;;  %s3376_s1 = inlined_call_operand.vmem [shape: bf16[8,1024], index: 1, kind: input, shape index: {}]   ;;  %s3377_s2 = inlined_call_operand.hbm [shape: bf16[8,512], index: 2, kind: input, shape index: {}]   ;;  %s3378_s3 = inlined_call_operand.vmem [shape: bf16[640,128], index: 3, kind: input, shape index: {}]   ;;  %s3379_s4 = inlined_call_operand.hbm [shape: bf16[1024,128], index: 4, kind: input, shape index: {}]   ;;  %s3380_s5 = inlined_call_operand.hbm [shape: bf16[512,128], index: 5, kind: input, shape index: {}]   ;;  %s3381_s6 = inlined_call_operand.vmem [shape: f32[1,384], index: 6, kind: input, shape index: {}]   ;;  %s3382_s7 = inlined_call_operand.vmem [shape: bf16[384,96], index: 7, kind: input, shape index: {}]   ;;  %s3383_s8 = inlined_call_operand.vmem [shape: f32[1,96], index: 8, kind: input, shape index: {}]   ;;  %s3384_s9 = inlined_call_operand.vmem [shape: bf16[96,64], index: 9, kind: input, shape index: {}]   ;;  %s3385_s10 = inlined_call_operand.vmem [shape: f32[1,64], index: 10, kind: input, shape index: {}]   ;;  %s3386_s11 = inlined_call_operand.vmem [shape: bf16[64,64], index: 11, kind: input, shape index: {}]   ;;  %s3387_s12 = inlined_call_operand.vmem [shape: f32[1,64], index: 12, kind: input, shape index: {}]   ;;  %s3388_s13 = inlined_call_operand.hbm [shape: f32[8,64], index: 13, kind: output, shape index: {}]  }
   0x1   :  { %19 = vsyncpa [#allocation6], 0 }
   0x2   :  { %20 = vsyncpa [#allocation4], 0  ;;  %s2951_s25 = smov [#allocation5]   ;;  %s2857_s29 = scalar_lea.hbm %s3379_s4, 8192 }
   0x3   :  { %s42_s26 = sshll.u32 %s2951_s25, 4  ;;  %p2858_p0 = scmp.ne.s32.totalorder %s3379_s4, %s2857_s29  ;;  %s43_s26 = int_to_ptr.vmem [resolvable:$true] %s42_s26 }
   0x4   :  { %p2861_p1 = scmp.lt.u32.totalorder %s2857_s29, %s3379_s4 }
   0x6   :  { %p2863_p2 = pnand %p2861_p1, %p2858_p0 }
   0x8   :  { %2866 = shalt.err (!%p2863_p2)
}
   0x9   :  { %s2867_s17 = scalar_lea.vmem %s43_s26, 8192  ;;  %p2872_p4 = scmp.lt.s32.totalorder %s43_s26, %s43_s26 }
   0xa   :  { %p2868_p3 = scmp.ne.s32.totalorder %s43_s26, %s2867_s17  ;;  %p2873_p5 = scmp.lt.s32.totalorder %s2867_s17, %s2867_s17 }
   0xc   :  { %p2874_p6 = por %p2873_p5, %p2872_p4 }
   0xe   :  { %p2875_p7 = pnand %p2874_p6, %p2868_p3 }
  0x10   :  { %2878 = shalt.err (!%p2875_p7)
}
  0x11   :  { %s2952_s18 = smov 64   ;;  %s2953_s19 = smov 4  }
  0x12   :  { %48 = dma.hbm_to_vmem [thread:$0]  %s3379_s4, 8192, %s43_s26, [#allocation6], %s2952_s18, %s2952_s18, %s2953_s19  }
  0x13   :  { %s2954_s22 = smov [#allocation2]   ;;  %s2955_s24 = smov [#allocation7]  }
  0x14   :  { %s31_s23 = sshll.u32 %s2954_s22, 4  ;;  %s54_s25 = sshll.u32 %s2955_s24, 4  ;;  %s32_s23 = int_to_ptr.vmem [resolvable:$true] %s31_s23  ;;  %s55_s25 = int_to_ptr.vmem [resolvable:$true] %s54_s25 }
  0x15   :  { %s2879_s29 = scalar_lea.hbm %s3377_s2, 256 }
  0x16   :  { %p2880_p8 = scmp.ne.s32.totalorder %s3377_s2, %s2879_s29  ;;  %p2883_p9 = scmp.lt.u32.totalorder %s2879_s29, %s3377_s2 }
  0x18   :  { %p2885_p10 = pnand %p2883_p9, %p2880_p8 }
  0x1a   :  { %2888 = shalt.err (!%p2885_p10)
}
  0x1b   :  { %s2889_s4 = scalar_lea.vmem %s32_s23, 256  ;;  %p2894_p12 = scmp.lt.s32.totalorder %s32_s23, %s32_s23 }
  0x1c   :  { %p2890_p11 = scmp.ne.s32.totalorder %s32_s23, %s2889_s4  ;;  %p2895_p13 = scmp.lt.s32.totalorder %s2889_s4, %s2889_s4 }
  0x1e   :  { %p2896_p0 = por %p2895_p13, %p2894_p12 }
  0x20   :  { %p2897_p1 = pnand %p2896_p0, %p2890_p11 }
  0x22   :  { %2900 = shalt.err (!%p2897_p1)
}
  0x23   :  { %34 = dma.hbm_to_vmem [thread:$0]  %s3377_s2, 256, %s32_s23, [#allocation3]  }
  0x24   :  { %s2901_s22 = scalar_lea.hbm %s3380_s5, 4096 }
  0x25   :  { %p2902_p2 = scmp.ne.s32.totalorder %s3380_s5, %s2901_s22  ;;  %p2905_p3 = scmp.lt.u32.totalorder %s2901_s22, %s3380_s5 }
  0x27   :  { %p2907_p4 = pnand %p2905_p3, %p2902_p2 }
  0x29   :  { %2910 = shalt.err (!%p2907_p4)
}
  0x2a   :  { %s2911_s30 = scalar_lea.vmem %s55_s25, 4096  ;;  %p2916_p6 = scmp.lt.s32.totalorder %s55_s25, %s55_s25 }
  0x2b   :  { %p2912_p5 = scmp.ne.s32.totalorder %s55_s25, %s2911_s30  ;;  %p2917_p7 = scmp.lt.s32.totalorder %s2911_s30, %s2911_s30 }
  0x2d   :  { %p2918_p8 = por %p2917_p7, %p2916_p6 }
  0x2f   :  { %p2919_p9 = pnand %p2918_p8, %p2912_p5 }
  0x31   :  { %2922 = shalt.err (!%p2919_p9)
}
  0x32   :  { %60 = dma.hbm_to_vmem [thread:$0]  %s3380_s5, 4096, %s55_s25, [#allocation6], %s2952_s18, %s2952_s18, %s2953_s19  }
  0x33   :  { %2945 = dma.done.wait [#allocation3], 256  }
  0x34   :  { %2946 = vsyncadd [#allocation3], 4294967040 }
  0x35   :  { %2947 = dma.done.wait [#allocation6], 12288  }
  0x36   :  { %2948 = vsyncadd [#allocation6], 4294955008  ;;  %v2652_v0 = vld [vmem:[%s3378_s3 + $0x40] sm:$0xff]   ;;  %v2656_v4 = vld [vmem:[%s3378_s3 + $0x48] sm:$0xff]   ;;  %v2956_v39 = vmov 0.0   ;;  %vm2957_vm0 = vmmov 0  }
  0x37   :  { %v2653_v1 = vld [vmem:[%s3378_s3 + $0xc0] sm:$0xff]   ;;  %2348 = vmatprep.subr.bf16.mxu0 %v2652_v0  ;;  %v2657_v5 = vld [vmem:[%s3378_s3 + $0xc8] sm:$0xff]   ;;  %v2660_v8 = vld [vmem:[%s3378_s3 + $0x50] sm:$0xff]   ;;  %vm1993_vm4 = vcmask 785408   ;;  %vm2088_vm6 = vcmask 523264   ;;  %s2958_s22 = smov [#allocation8]  }
  0x38   :  { %v2654_v2 = vld [vmem:[%s3378_s3] sm:$0xff]   ;;  %2370 = vmatprep.subr.bf16.mxu1 %v2653_v1  ;;  %v2658_v6 = vld [vmem:[%s3378_s3 + $0x8] sm:$0xff]   ;;  %v2661_v9 = vld [vmem:[%s3378_s3 + $0xd0] sm:$0xff]   ;;  %s2146_s24 = sshll.u32 %s2958_s22, 4  ;;  %s2147_s24 = int_to_ptr.vmem [resolvable:$true] %s2146_s24 }
  0x39   :  { %v2655_v3 = vld [vmem:[%s3378_s3 + $0x80] sm:$0xff]   ;;  %2349 = vmatpush3.bf16.msra.mxu0 %v2654_v2  ;;  %v2659_v7 = vld [vmem:[%s3378_s3 + $0x88] sm:$0xff]   ;;  %v2662_v10 = vld [vmem:[%s3378_s3 + $0x10] sm:$0xff]   ;;  %p2928_p11 = scmp.lt.s32.totalorder %s2147_s24, %s2147_s24 }
  0x3a   :  { %2371 = vmatpush3.bf16.msra.mxu1 %v2655_v3  ;;  %2350 = vmatprep.subr.bf16.mxu0 %v2656_v4  ;;  %v2663_v11 = vld [vmem:[%s3378_s3 + $0x90] sm:$0xff]   ;;  %v2664_v12 = vld [vmem:[%s3378_s3 + $0x58] sm:$0xff]   ;;  %v2668_v16 = vld [vmem:[%s3378_s3 + $0x60] sm:$0xff]  }
  0x3b   :  { %2372 = vmatprep.subr.bf16.mxu1 %v2657_v5  ;;  %v2665_v13 = vld [vmem:[%s3378_s3 + $0xd8] sm:$0xff]   ;;  %v2669_v17 = vld [vmem:[%s3378_s3 + $0xe0] sm:$0xff]   ;;  %v2672_v20 = vld [vmem:[%s3378_s3 + $0x68] sm:$0xff]  }
  0x3c   :  { %v2666_v14 = vld [vmem:[%s3378_s3 + $0x18] sm:$0xff]   ;;  %v2670_v18 = vld [vmem:[%s3378_s3 + $0x20] sm:$0xff]   ;;  %v2673_v21 = vld [vmem:[%s3378_s3 + $0xe8] sm:$0xff]  }
  0x3d   :  { %2351 = vmatpush3.bf16.msra.mxu0 %v2658_v6  ;;  %v2667_v15 = vld [vmem:[%s3378_s3 + $0x98] sm:$0xff]   ;;  %v2671_v19 = vld [vmem:[%s3378_s3 + $0xa0] sm:$0xff]   ;;  %v2674_v22 = vld [vmem:[%s3378_s3 + $0x28] sm:$0xff]  }
  0x3e   :  { %2373 = vmatpush3.bf16.msra.mxu1 %v2659_v7  ;;  %2352 = vmatprep.subr.bf16.mxu0 %v2660_v8  ;;  %v2675_v23 = vld [vmem:[%s3378_s3 + $0xa8] sm:$0xff]   ;;  %v2676_v24 = vld [vmem:[%s3378_s3 + $0x70] sm:$0xff]   ;;  %v2680_v28 = vld [vmem:[%s3378_s3 + $0x78] sm:$0xff]  }
  0x3f   :  { %2374 = vmatprep.subr.bf16.mxu1 %v2661_v9  ;;  %v2677_v25 = vld [vmem:[%s3378_s3 + $0xf0] sm:$0xff]   ;;  %v2681_v29 = vld [vmem:[%s3378_s3 + $0xf8] sm:$0xff]   ;;  %v85_v32 = vld [vmem:[%s3375_s0] sm:$0xff] }
  0x40   :  { %v2678_v26 = vld [vmem:[%s3378_s3 + $0x30] sm:$0xff]   ;;  %v2682_v30 = vld [vmem:[%s3378_s3 + $0x38] sm:$0xff]   ;;  %v86_v33 = vld [vmem:[%s3375_s0 + $0x8] sm:$0xff]  ;;  %v2156_v34 = vcombine.low %v85_v32, %v85_v32  ;;  %v2157_v35 = vcombine.high %v85_v32, %v85_v32 }
  0x41   :  { %2353 = vmatpush3.bf16.msra.mxu0 %v2662_v10  ;;  %v2679_v27 = vld [vmem:[%s3378_s3 + $0xb0] sm:$0xff]   ;;  %v2683_v31 = vld [vmem:[%s3378_s3 + $0xb8] sm:$0xff]   ;;  %v2158_v36 = vcombine.low %v86_v33, %v86_v33  ;;  %v2159_v37 = vcombine.high %v86_v33, %v86_v33  ;;  %v2688_v38 = vld [vmem:[%s3378_s3 + $0x100] sm:$0xff]  }
  0x42   :  { %2375 = vmatpush3.bf16.msra.mxu1 %v2663_v11  ;;  %2354 = vmatprep.subr.bf16.mxu0 %v2664_v12  ;;  %v2689_v40 = vld [vmem:[#allocation5 + $0x40] sm:$0xff]   ;;  %v2691_v42 = vld [vmem:[%s3378_s3 + $0x108] sm:$0xff]   ;;  %v2692_v43 = vld [vmem:[#allocation5 + $0x48] sm:$0xff]  }
  0x43   :  { %2376 = vmatprep.subr.bf16.mxu1 %v2665_v13  ;;  %458 = vmatprep.mubr.bf16.mxu0 %v2157_v35  ;;  %v2690_v41 = vld [vmem:[#allocation5] sm:$0xff]   ;;  %v2693_v44 = vld [vmem:[#allocation5 + $0x8] sm:$0xff]   ;;  %v2695_v45 = vld [vmem:[#allocation5 + $0x50] sm:$0xff]  }
  0x44   :  { %498 = vmatprep.mubr.bf16.mxu1 %v2159_v37  ;;  %v2694_v46 = vld [vmem:[%s3378_s3 + $0x110] sm:$0xff]   ;;  %v2696_v47 = vld [vmem:[#allocation5 + $0x10] sm:$0xff]   ;;  %v2698_v48 = vld [vmem:[#allocation5 + $0x58] sm:$0xff]  }
  0x45   :  { %2355 = vmatpush3.bf16.msra.mxu0 %v2666_v14  ;;  %v2697_v49 = vld [vmem:[%s3378_s3 + $0x118] sm:$0xff]   ;;  %v2699_v50 = vld [vmem:[#allocation5 + $0x18] sm:$0xff]   ;;  %v2701_v51 = vld [vmem:[#allocation5 + $0x60] sm:$0xff]  }
  0x46   :  { %2377 = vmatpush3.bf16.msra.mxu1 %v2667_v15  ;;  %2356 = vmatprep.subr.bf16.mxu0 %v2668_v16  ;;  %v2700_v52 = vld [vmem:[%s3378_s3 + $0x120] sm:$0xff]   ;;  %v2702_v53 = vld [vmem:[#allocation5 + $0x20] sm:$0xff]   ;;  %v2704_v54 = vld [vmem:[#allocation5 + $0x68] sm:$0xff]  }
  0x47   :  { %2378 = vmatprep.subr.bf16.mxu1 %v2669_v17  ;;  %v2703_v55 = vld [vmem:[%s3378_s3 + $0x128] sm:$0xff]   ;;  %v2705_v56 = vld [vmem:[#allocation5 + $0x28] sm:$0xff]   ;;  %v2707_v57 = vld [vmem:[#allocation5 + $0x70] sm:$0xff]  }
  0x48   :  { %v2706_v58 = vld [vmem:[%s3378_s3 + $0x130] sm:$0xff]   ;;  %v2708_v59 = vld [vmem:[#allocation5 + $0x30] sm:$0xff]   ;;  %v2710_v60 = vld [vmem:[#allocation5 + $0x78] sm:$0xff]  }
  0x49   :  { %2357 = vmatpush3.bf16.msra.mxu0 %v2670_v18  ;;  %v546_v61 = vld [vmem:[%s3376_s1] sm:$0xff]  ;;  %v2709_v62 = vld [vmem:[%s3378_s3 + $0x138] sm:$0xff]   ;;  %v2711_v0 = vld [vmem:[#allocation5 + $0x38] sm:$0xff]  }
  0x4a   :  { %2379 = vmatpush3.bf16.msra.mxu1 %v2671_v19  ;;  %2358 = vmatprep.subr.bf16.mxu0 %v2672_v20  ;;  %v2202_v63 = vcombine.high %v546_v61, %v546_v61  ;;  %v2712_v1 = vld [vmem:[%s3375_s0 + $0x10] ss:$0 sps:$4 sm:$0xff]   ;;  %v2201_v5 = vcombine.low %v546_v61, %v546_v61  ;;  %v2719_v7 = vld [vmem:[#allocation5 + $0xc8] sm:$0xff]   ;;  %v2723_v11 = vld [vmem:[#allocation5 + $0xd0] sm:$0xff]  }
  0x4b   :  { %2380 = vmatprep.subr.bf16.mxu1 %v2673_v21  ;;  %v2713_v2 = vld [vmem:[#allocation5 + $0xc0] sm:$0xff]   ;;  %v2721_v8 = vld [vmem:[#allocation5 + $0x148] sm:$0xff]   ;;  %v2725_v12 = vld [vmem:[#allocation5 + $0x150] sm:$0xff]  }
  0x4c   :  { %v2717_v3 = vld [vmem:[#allocation5 + $0x140] sm:$0xff]   ;;  %v2720_v9 = vld [vmem:[#allocation5 + $0x88] sm:$0xff]   ;;  %v2724_v13 = vld [vmem:[#allocation5 + $0x90] sm:$0xff]  }
  0x4d   :  { %2359 = vmatpush3.bf16.msra.mxu0 %v2674_v22  ;;  %v2714_v4 = vld [vmem:[#allocation5 + $0x80] sm:$0xff]   ;;  %v2722_v10 = vld [vmem:[#allocation5 + $0x108] sm:$0xff]   ;;  %v2726_v14 = vld [vmem:[#allocation5 + $0x110] sm:$0xff]  }
  0x4e   :  { %2381 = vmatpush3.bf16.msra.mxu1 %v2675_v23  ;;  %2360 = vmatprep.subr.bf16.mxu0 %v2676_v24  ;;  %v2718_v6 = vld [vmem:[#allocation5 + $0x100] sm:$0xff]   ;;  %v2727_v15 = vld [vmem:[#allocation5 + $0xd8] sm:$0xff]   ;;  %v2735_v23 = vld [vmem:[#allocation5 + $0xe8] sm:$0xff]  }
  0x4f   :  { %2382 = vmatprep.subr.bf16.mxu1 %v2677_v25  ;;  %v2729_v16 = vld [vmem:[#allocation5 + $0x158] sm:$0xff]   ;;  %v2731_v19 = vld [vmem:[#allocation5 + $0xe0] sm:$0xff]   ;;  %v2737_v24 = vld [vmem:[#allocation5 + $0x168] sm:$0xff]  }
  0x50   :  { %v2728_v17 = vld [vmem:[#allocation5 + $0x98] sm:$0xff]   ;;  %v2733_v20 = vld [vmem:[#allocation5 + $0x160] sm:$0xff]   ;;  %v2736_v25 = vld [vmem:[#allocation5 + $0xa8] sm:$0xff]  }
  0x51   :  { %2361 = vmatpush3.bf16.msra.mxu0 %v2678_v26  ;;  %v2730_v18 = vld [vmem:[#allocation5 + $0x118] sm:$0xff]   ;;  %v2732_v21 = vld [vmem:[#allocation5 + $0xa0] sm:$0xff]   ;;  %v2738_v26 = vld [vmem:[#allocation5 + $0x128] sm:$0xff]  }
  0x52   :  { %2383 = vmatpush3.bf16.msra.mxu1 %v2679_v27  ;;  %2362 = vmatprep.subr.bf16.mxu0 %v2680_v28  ;;  %v2734_v22 = vld [vmem:[#allocation5 + $0x120] sm:$0xff]   ;;  %v2739_v27 = vld [vmem:[#allocation5 + $0xf0] sm:$0xff]   ;;  %v2743_v32 = vld [vmem:[#allocation5 + $0xf8] sm:$0xff]  }
  0x53   :  { %2384 = vmatprep.subr.bf16.mxu1 %v2681_v29  ;;  %v2740_v28 = vld [vmem:[#allocation5 + $0xb0] sm:$0xff]   ;;  %v548_v35 = vld [vmem:[%s3376_s1 + $0x10] sm:$0xff] }
  0x54   :  { %v2741_v29 = vld [vmem:[#allocation5 + $0x170] sm:$0xff]   ;;  %v2206_v37 = vcombine.high %v548_v35, %v548_v35 }
  0x55   :  { %2363 = vmatpush3.bf16.msra.mxu0 %v2682_v30  ;;  %v2742_v30 = vld [vmem:[#allocation5 + $0x130] sm:$0xff]  }
  0x56   :  { %2385 = vmatpush3.bf16.msra.mxu1 %v2683_v31  ;;  %2576 = vmatprep.subr.bf16.mxu0 %v2956_v39  ;;  %v547_v31 = vld [vmem:[%s3376_s1 + $0x8] sm:$0xff]  ;;  %v2778_v61 = vld [vmem:[#allocation7 + $0x10] sm:$0xff]  }
  0x57   :  { %2401 = vmatprep.subr.bf16.mxu1 %v2689_v40  ;;  %v2204_v33 = vcombine.high %v547_v31, %v547_v31  ;;  %v2749_v40 = vld [vmem:[#allocation5 + $0x1c0] sm:$0xff]  }
  0x58   :  { %459 = vmatmul.mubr.bf16.vlgmr.msra.gmra.mrb[0].mxu0 %v2156_v34  ;;  %v2745_v34 = vld [vmem:[#allocation5 + $0x178] sm:$0xff]  }
  0x59   :  { %499 = vmatmul.mubr.bf16.vlgmr.msra.gmra.mrb[0].mxu1 %v2158_v36  ;;  %2577 = vmatpush3.bf16.msra.mxu0 %v2688_v38  ;;  %v2744_v36 = vld [vmem:[#allocation5 + $0xb8] sm:$0xff]  }
  0x5a   :  { %2402 = vmatpush3.bf16.msra.mxu1 %v2690_v41  ;;  %2578 = vmatprep.subr.bf16.mxu0 %v2956_v39  ;;  %v2748_v38 = vld [vmem:[#allocation5 + $0x138] sm:$0xff]   ;;  %v2203_v41 = vcombine.low %v547_v31, %v547_v31  ;;  %v2797_v31 = vld [vmem:[#allocation7 + $0xb0] sm:$0xff]  }
  0x5b   :  { %2403 = vmatprep.subr.bf16.mxu1 %v2692_v43  ;;  %2592 = vmatprep.mubr.msk.bf16.mxu0 %vm2957_vm0, %v2956_v39  ;;  %v2752_v43 = vld [vmem:[#allocation5 + $0x180] sm:$0xff]  }
  0x5c   :  { %1122 = vmatprep.mubr.bf16.mxu1 %v2202_v63  ;;  %v2780_v63 = vld [vmem:[#allocation7 + $0x58] sm:$0xff]  }
  0x5d   :  { %2579 = vmatpush3.bf16.msra.mxu0 %v2691_v42  ;;  %v2205_v42 = vcombine.low %v548_v35, %v548_v35  ;;  %v2805_v35 = vld [vmem:[%s3382_s7 + $0x40] sm:$0xff]  }
  0x5e   :  { %2404 = vmatpush3.bf16.msra.mxu1 %v2693_v44  ;;  %2580 = vmatprep.subr.bf16.mxu0 %v2956_v39  ;;  %v2753_v44 = vld [vmem:[#allocation5 + $0x1c8] sm:$0xff]  }
  0x5f   :  { %2405 = vmatprep.subr.bf16.mxu1 %v2695_v45  ;;  %v2754_v45 = vld [vmem:[#allocation5 + $0x188] sm:$0xff]  }
  0x61   :  { %2581 = vmatpush3.bf16.msra.mxu0 %v2694_v46  ;;  %v2755_v46 = vld [vmem:[#allocation5 + $0x1d0] sm:$0xff]  }
  0x62   :  { %2406 = vmatpush3.bf16.msra.mxu1 %v2696_v47  ;;  %2582 = vmatprep.subr.bf16.mxu0 %v2956_v39  ;;  %v2756_v47 = vld [vmem:[#allocation5 + $0x190] sm:$0xff]  }
  0x63   :  { %2407 = vmatprep.subr.bf16.mxu1 %v2698_v48  ;;  %v2757_v48 = vld [vmem:[#allocation5 + $0x1d8] sm:$0xff]  }
  0x65   :  { %2583 = vmatpush3.bf16.msra.mxu0 %v2697_v49  ;;  %v2758_v49 = vld [vmem:[#allocation5 + $0x198] sm:$0xff]  }
  0x66   :  { %2408 = vmatpush3.bf16.msra.mxu1 %v2699_v50  ;;  %2584 = vmatprep.subr.bf16.mxu0 %v2956_v39  ;;  %v2767_v50 = vld [vmem:[#allocation7 + $0x40] sm:$0xff]  }
  0x67   :  { %2409 = vmatprep.subr.bf16.mxu1 %v2701_v51  ;;  %v2768_v51 = vld [vmem:[#allocation7] sm:$0xff]  }
  0x69   :  { %2585 = vmatpush3.bf16.msra.mxu0 %v2700_v52  ;;  %v549_v52 = vld [vmem:[%s3376_s1 + $0x18] sm:$0xff] }
  0x6a   :  { %2410 = vmatpush3.bf16.msra.mxu1 %v2702_v53  ;;  %2586 = vmatprep.subr.bf16.mxu0 %v2956_v39  ;;  %v2759_v53 = vld [vmem:[#allocation5 + $0x1e0] sm:$0xff]  }
  0x6b   :  { %2411 = vmatprep.subr.bf16.mxu1 %v2704_v54  ;;  %v2208_v54 = vcombine.high %v549_v52, %v549_v52 }
  0x6d   :  { %2587 = vmatpush3.bf16.msra.mxu0 %v2703_v55  ;;  %v2772_v55 = vld [vmem:[#allocation7 + $0x48] sm:$0xff]  }
  0x6e   :  { %2412 = vmatpush3.bf16.msra.mxu1 %v2705_v56  ;;  %2588 = vmatprep.subr.bf16.mxu0 %v2956_v39  ;;  %v2760_v56 = vld [vmem:[#allocation5 + $0x1a0] sm:$0xff]  }
  0x6f   :  { %2413 = vmatprep.subr.bf16.mxu1 %v2707_v57  ;;  %v2774_v57 = vld [vmem:[#allocation7 + $0x8] sm:$0xff]  }
  0x71   :  { %2589 = vmatpush3.bf16.msra.mxu0 %v2706_v58  ;;  %v2761_v58 = vld [vmem:[#allocation5 + $0x1e8] sm:$0xff]  }
  0x72   :  { %2414 = vmatpush3.bf16.msra.mxu1 %v2708_v59  ;;  %2590 = vmatprep.subr.bf16.mxu0 %v2956_v39  ;;  %v2776_v59 = vld [vmem:[#allocation7 + $0x50] sm:$0xff]  }
  0x73   :  { %2415 = vmatprep.subr.bf16.mxu1 %v2710_v60  ;;  %v2762_v60 = vld [vmem:[#allocation5 + $0x1a8] sm:$0xff]  }
  0x75   :  { %2591 = vmatpush3.bf16.msra.mxu0 %v2709_v62  ;;  %v2763_v62 = vld [vmem:[#allocation5 + $0x1f0] sm:$0xff]  }
  0x76   :  { %2416 = vmatpush3.bf16.msra.mxu1 %v2711_v0  ;;  %2423 = vmatprep.subr.bf16.mxu0 %v2713_v2  ;;  %v2764_v0 = vld [vmem:[#allocation5 + $0x1b0] sm:$0xff]   ;;  %v2765_v2 = vld [vmem:[#allocation5 + $0x1f8] sm:$0xff]  }
  0x77   :  { %2445 = vmatprep.subr.bf16.mxu1 %v2717_v3  ;;  %v2784_v3 = vld [vmem:[#allocation7 + $0x60] sm:$0xff]  }
  0x78   :  { %2593 = vmatmul.mubr.bf16.vlgmr.msra.gmra.mrb[4].mxu0 %v2712_v1  ;;  %v2782_v1 = vld [vmem:[#allocation7 + $0x18] sm:$0xff]  }
  0x79   :  { %2424 = vmatpush3.bf16.msra.mxu0 %v2714_v4  ;;  %1123 = vmatmul.mubr.bf16.vlgmr.msra.gmra.mrb[4].mxu1 %v2201_v5  ;;  %v2766_v4 = vld [vmem:[#allocation5 + $0x1b8] sm:$0xff]   ;;  %v2786_v5 = vld [vmem:[#allocation7 + $0x20] sm:$0xff]  }
  0x7a   :  { %2446 = vmatpush3.bf16.msra.mxu1 %v2718_v6  ;;  %2425 = vmatprep.subr.bf16.mxu0 %v2719_v7  ;;  %v2771_v6 = vld [vmem:[#allocation7 + $0xc0] sm:$0xff]   ;;  %v2788_v7 = vld [vmem:[#allocation7 + $0x68] sm:$0xff]  }
  0x7b   :  { %2447 = vmatprep.subr.bf16.mxu1 %v2721_v8  ;;  %1162 = vmatprep.mubr.bf16.mxu0 %v2204_v33  ;;  %v2773_v8 = vld [vmem:[#allocation7 + $0x80] sm:$0xff]   ;;  %v2802_v33 = vld [vmem:[#allocation7 + $0xb8] sm:$0xff]  }
  0x7c   :  { %1202 = vmatprep.mubr.bf16.mxu1 %v2206_v37  ;;  %v2807_v37 = vld [vmem:[%s3382_s7 + $0x48] sm:$0xff]  }
  0x7d   :  { %2426 = vmatpush3.bf16.msra.mxu0 %v2720_v9  ;;  %v2207_v9 = vcombine.low %v549_v52, %v549_v52 }
  0x7e   :  { %2448 = vmatpush3.bf16.msra.mxu1 %v2722_v10  ;;  %2427 = vmatprep.subr.bf16.mxu0 %v2723_v11  ;;  %v2790_v10 = vld [vmem:[#allocation7 + $0x28] sm:$0xff]  }
  0x7f   :  { %2449 = vmatprep.subr.bf16.mxu1 %v2725_v12  ;;  %v2775_v11 = vld [vmem:[#allocation7 + $0xc8] sm:$0xff]   ;;  %v2792_v12 = vld [vmem:[#allocation7 + $0x70] sm:$0xff]  }
  0x81   :  { %2428 = vmatpush3.bf16.msra.mxu0 %v2724_v13  ;;  %v2777_v13 = vld [vmem:[#allocation7 + $0x88] sm:$0xff]  }
  0x82   :  { %2450 = vmatpush3.bf16.msra.mxu1 %v2726_v14  ;;  %2429 = vmatprep.subr.bf16.mxu0 %v2727_v15  ;;  %v2794_v14 = vld [vmem:[#allocation7 + $0x30] sm:$0xff]  }
  0x83   :  { %2451 = vmatprep.subr.bf16.mxu1 %v2729_v16  ;;  %v2779_v15 = vld [vmem:[#allocation7 + $0xd0] sm:$0xff]   ;;  %v2796_v16 = vld [vmem:[#allocation7 + $0x78] sm:$0xff]  }
  0x85   :  { %2430 = vmatpush3.bf16.msra.mxu0 %v2728_v17  ;;  %v2798_v17 = vld [vmem:[#allocation7 + $0x38] sm:$0xff]  }
  0x86   :  { %2452 = vmatpush3.bf16.msra.mxu1 %v2730_v18  ;;  %2431 = vmatprep.subr.bf16.mxu0 %v2731_v19  ;;  %v1250_v18 = vld [vmem:[#allocation2] sm:$0xff] }
  0x87   :  { %2453 = vmatprep.subr.bf16.mxu1 %v2733_v20  ;;  %v2781_v19 = vld [vmem:[#allocation7 + $0x90] sm:$0xff]   ;;  %v2273_v20 = vcombine.low %v1250_v18, %v1250_v18 }
  0x89   :  { %2432 = vmatpush3.bf16.msra.mxu0 %v2732_v21  ;;  %v2274_v21 = vcombine.high %v1250_v18, %v1250_v18  ;;  %v1604_v18 = vlaneseq }
  0x8a   :  { %2454 = vmatpush3.bf16.msra.mxu1 %v2734_v22  ;;  %2433 = vmatprep.subr.bf16.mxu0 %v2735_v23  ;;  %v2783_v22 = vld [vmem:[#allocation7 + $0xd8] sm:$0xff]  }
  0x8b   :  { %2455 = vmatprep.subr.bf16.mxu1 %v2737_v24  ;;  %v2785_v23 = vld [vmem:[#allocation7 + $0x98] sm:$0xff]  }
  0x8c   :  { %v1251_v24 = vld [vmem:[#allocation2 + $0x8] sm:$0xff] }
  0x8d   :  { %2434 = vmatpush3.bf16.msra.mxu0 %v2736_v25  ;;  %v2787_v25 = vld [vmem:[#allocation7 + $0xe0] sm:$0xff]  }
  0x8e   :  { %2456 = vmatpush3.bf16.msra.mxu1 %v2738_v26  ;;  %2435 = vmatprep.subr.bf16.mxu0 %v2739_v27  ;;  %v2276_v26 = vcombine.high %v1251_v24, %v1251_v24  ;;  %v2789_v27 = vld [vmem:[#allocation7 + $0xa0] sm:$0xff]  }
  0x8f   :  { %2457 = vmatprep.subr.bf16.mxu1 %v2741_v29  ;;  %v2793_v29 = vld [vmem:[#allocation7 + $0xa8] sm:$0xff]  }
  0x91   :  { %2436 = vmatpush3.bf16.msra.mxu0 %v2740_v28  ;;  %v2791_v28 = vld [vmem:[#allocation7 + $0xe8] sm:$0xff]  }
  0x92   :  { %2458 = vmatpush3.bf16.msra.mxu1 %v2742_v30  ;;  %2437 = vmatprep.subr.bf16.mxu0 %v2743_v32  ;;  %v2795_v30 = vld [vmem:[#allocation7 + $0xf0] sm:$0xff]   ;;  %v2801_v32 = vld [vmem:[#allocation7 + $0xf8] sm:$0xff]  }
  0x93   :  { %2459 = vmatprep.subr.bf16.mxu1 %v2745_v34  ;;  %v2275_v34 = vcombine.low %v1251_v24, %v1251_v24 }
  0x95   :  { %2438 = vmatpush3.bf16.msra.mxu0 %v2744_v36  ;;  %v2806_v36 = vld [vmem:[%s3382_s7] sm:$0xff]  }
  0x96   :  { %2460 = vmatpush3.bf16.msra.mxu1 %v2748_v38  ;;  %2467 = vmatprep.subr.bf16.mxu0 %v2749_v40  ;;  %v2808_v38 = vld [vmem:[%s3382_s7 + $0x8] sm:$0xff]   ;;  %v2809_v40 = vld [vmem:[%s3382_s7 + $0x50] sm:$0xff]  }
  0x97   :  { %2489 = vmatprep.subr.bf16.mxu1 %v2767_v50 }
  0x98   :  { %1163 = vmatmul.mubr.bf16.vlgmr.msra.gmra.mrb[8].mxu0 %v2203_v41  ;;  %v2810_v41 = vld [vmem:[%s3382_s7 + $0x10] sm:$0xff]  }
  0x99   :  { %2468 = vmatpush3.bf16.msra.mxu0 %v2752_v43  ;;  %1203 = vmatmul.mubr.bf16.vlgmr.msra.gmra.mrb[8].mxu1 %v2205_v42  ;;  %v2811_v42 = vld [vmem:[%s3382_s7 + $0x58] sm:$0xff]  }
  0x9a   :  { %2469 = vmatprep.subr.bf16.mxu0 %v2753_v44  ;;  %2490 = vmatpush3.bf16.msra.mxu1 %v2768_v51  ;;  %v2812_v43 = vld [vmem:[%s3382_s7 + $0x18] sm:$0xff]   ;;  %v2813_v44 = vld [vmem:[%s3382_s7 + $0x60] sm:$0xff]  }
  0x9b   :  { %1242 = vmatprep.mubr.bf16.mxu0 %v2208_v54  ;;  %2491 = vmatprep.subr.bf16.mxu1 %v2772_v55  ;;  %v2815_v54 = vld [vmem:[%s3382_s7 + $0x68] sm:$0xff]  }
  0x9c   :  { %1554 = vmatprep.mubr.bf16.mxu1 %v2274_v21 }
  0x9d   :  { %2470 = vmatpush3.bf16.msra.mxu0 %v2754_v45  ;;  %v2814_v45 = vld [vmem:[%s3382_s7 + $0x20] sm:$0xff]  }
  0x9e   :  { %2471 = vmatprep.subr.bf16.mxu0 %v2755_v46  ;;  %2492 = vmatpush3.bf16.msra.mxu1 %v2774_v57  ;;  %v2816_v57 = vld [vmem:[%s3382_s7 + $0x28] sm:$0xff]  }
  0x9f   :  { %2493 = vmatprep.subr.bf16.mxu1 %v2776_v59  ;;  %v2817_v59 = vld [vmem:[%s3382_s7 + $0x70] sm:$0xff]  }
  0xa1   :  { %2472 = vmatpush3.bf16.msra.mxu0 %v2756_v47 }
  0xa2   :  { %2473 = vmatprep.subr.bf16.mxu0 %v2757_v48  ;;  %2494 = vmatpush3.bf16.msra.mxu1 %v2778_v61  ;;  %v2819_v61 = vld [vmem:[%s3382_s7 + $0x78] sm:$0xff]  }
  0xa3   :  { %2495 = vmatprep.subr.bf16.mxu1 %v2780_v63  ;;  %v2821_v63 = vld [vmem:[%s3382_s7 + $0x80] sm:$0xff]  }
  0xa5   :  { %2474 = vmatpush3.bf16.msra.mxu0 %v2758_v49 }
  0xa6   :  { %2475 = vmatprep.subr.bf16.mxu0 %v2759_v53  ;;  %2496 = vmatpush3.bf16.msra.mxu1 %v2782_v1  ;;  %v2823_v1 = vld [vmem:[%s3382_s7 + $0x90] sm:$0xff]  }
  0xa7   :  { %2497 = vmatprep.subr.bf16.mxu1 %v2784_v3  ;;  %v2825_v3 = vld [vmem:[%s3382_s7 + $0xa0] sm:$0xff]  }
  0xa9   :  { %2476 = vmatpush3.bf16.msra.mxu0 %v2760_v56 }
  0xaa   :  { %2477 = vmatprep.subr.bf16.mxu0 %v2761_v58  ;;  %2498 = vmatpush3.bf16.msra.mxu1 %v2786_v5  ;;  %v2826_v5 = vld [vmem:[%s3382_s7 + $0xa8] sm:$0xff]  }
  0xab   :  { %2499 = vmatprep.subr.bf16.mxu1 %v2788_v7 }
  0xad   :  { %2478 = vmatpush3.bf16.msra.mxu0 %v2762_v60  ;;  %v2818_v60 = vld [vmem:[%s3382_s7 + $0x30] sm:$0xff]  }
  0xae   :  { %2479 = vmatprep.subr.bf16.mxu0 %v2763_v62  ;;  %2500 = vmatpush3.bf16.msra.mxu1 %v2790_v10  ;;  %v2820_v62 = vld [vmem:[%s3382_s7 + $0x38] sm:$0xff]  }
  0xaf   :  { %2501 = vmatprep.subr.bf16.mxu1 %v2792_v12 }
  0xb1   :  { %2480 = vmatpush3.bf16.msra.mxu0 %v2764_v0  ;;  %v2822_v0 = vld [vmem:[%s3382_s7 + $0x88] sm:$0xff]  }
  0xb2   :  { %2481 = vmatprep.subr.bf16.mxu0 %v2765_v2  ;;  %2502 = vmatpush3.bf16.msra.mxu1 %v2794_v14  ;;  %v2824_v2 = vld [vmem:[%s3382_s7 + $0x98] sm:$0xff]  }
  0xb3   :  { %2503 = vmatprep.subr.bf16.mxu1 %v2796_v16  ;;  %v2828_v16 = vld [vmem:[%s3382_s7 + $0xb8] sm:$0xff]  }
  0xb5   :  { %2482 = vmatpush3.bf16.msra.mxu0 %v2766_v4 }
  0xb6   :  { %2511 = vmatprep.subr.bf16.mxu0 %v2771_v6  ;;  %2504 = vmatpush3.bf16.msra.mxu1 %v2798_v17 }
  0xb7   :  { %2533 = vmatprep.subr.bf16.mxu1 %v2805_v35 }
  0xb8   :  { %1243 = vmatmul.mubr.bf16.vlgmr.msra.gmra.mrb[12].mxu0 %v2207_v9 }
  0xb9   :  { %2512 = vmatpush3.bf16.msra.mxu0 %v2773_v8  ;;  %1555 = vmatmul.mubr.bf16.vlgmr.msra.gmra.mrb[12].mxu1 %v2273_v20 }
  0xba   :  { %2513 = vmatprep.subr.bf16.mxu0 %v2775_v11  ;;  %1594 = vmatprep.mubr.bf16.mxu0 %v2276_v26 }
  0xbb   :  { %2534 = vmatpush3.bf16.msra.mxu1 %v2806_v36 }
  0xbc   :  { %2535 = vmatprep.subr.bf16.mxu1 %v2807_v37 }
  0xbd   :  { %2514 = vmatpush3.bf16.msra.mxu0 %v2777_v13 }
  0xbe   :  { %2515 = vmatprep.subr.bf16.mxu0 %v2779_v15  ;;  %v2827_v15 = vld [vmem:[%s3382_s7 + $0xb0] sm:$0xff]  }
  0xbf   :  { %2536 = vmatpush3.bf16.msra.mxu1 %v2808_v38 }
  0xc0   :  { %2537 = vmatprep.subr.bf16.mxu1 %v2809_v40 }
  0xc1   :  { %2516 = vmatpush3.bf16.msra.mxu0 %v2781_v19 }
  0xc2   :  { %2517 = vmatprep.subr.bf16.mxu0 %v2783_v22 }
  0xc3   :  { %2538 = vmatpush3.bf16.msra.mxu1 %v2810_v41 }
  0xc4   :  { %2539 = vmatprep.subr.bf16.mxu1 %v2811_v42 }
  0xc5   :  { %2518 = vmatpush3.bf16.msra.mxu0 %v2785_v23 }
  0xc6   :  { %2519 = vmatprep.subr.bf16.mxu0 %v2787_v25 }
  0xc7   :  { %2540 = vmatpush3.bf16.msra.mxu1 %v2812_v43 }
  0xc8   :  { %2541 = vmatprep.subr.bf16.mxu1 %v2813_v44 }
  0xc9   :  { %2520 = vmatpush3.bf16.msra.mxu0 %v2789_v27 }
  0xca   :  { %2521 = vmatprep.subr.bf16.mxu0 %v2791_v28 }
  0xcb   :  { %2542 = vmatpush3.bf16.msra.mxu1 %v2814_v45 }
  0xcc   :  { %2543 = vmatprep.subr.bf16.mxu1 %v2815_v54 }
  0xcd   :  { %2522 = vmatpush3.bf16.msra.mxu0 %v2793_v29  ;;  %v1605_v29 = vshrl.u32 %v1604_v18, 7 }
  0xce   :  { %2523 = vmatprep.subr.bf16.mxu0 %v2795_v30 }
  0xcf   :  { %2544 = vmatpush3.bf16.msra.mxu1 %v2816_v57  ;;  %v1610_v37 = vsub.s32 1, %v1605_v29 }
  0xd0   :  { %2545 = vmatprep.subr.bf16.mxu1 %v2817_v59 }
  0xd1   :  { %2524 = vmatpush3.bf16.msra.mxu0 %v2797_v31  ;;  %v1606_v31 = vsub.s32 0, %v1605_v29 }
  0xd2   :  { %2525 = vmatprep.subr.bf16.mxu0 %v2801_v32  ;;  %v1602_v32 = vld [vmem:[%s3381_s6] sm:$0x7] }
  0xd3   :  { %2546 = vmatpush3.bf16.msra.mxu1 %v2818_v60  ;;  %v1611_v42 = vrot.slane %v1602_v32, %v1610_v37 }
  0xd4   :  { %2547 = vmatprep.subr.bf16.mxu1 %v2819_v61 }
  0xd5   :  { %2526 = vmatpush3.bf16.msra.mxu0 %v2802_v33  ;;  %v1607_v33 = vrot.slane %v1602_v32, %v1606_v31  ;;  %v2832_v31 = vld [vmem:[%s3384_s9 + $0x18] sm:$0xff]  }
  0xd6   :  { %2596 = vmatprep.subr.bf16.mxu0 %v2956_v39 }
  0xd7   :  { %2548 = vmatpush3.bf16.msra.mxu1 %v2820_v62  ;;  %v1614_v62 = vsub.s32 2, %v1605_v29  ;;  %v2830_v29 = vld [vmem:[%s3384_s9 + $0x8] sm:$0xff]  }
  0xd8   :  { %1595 = vmatmul.mubr.bf16.vlgmr.msra.gmra.mrb[16].mxu0 %v2275_v34  ;;  %2616 = vmatprep.subr.bf16.mxu1 %v2956_v39 }
  0xd9   :  { %2612 = vmatprep.mubr.msk.bf16.mxu0 %vm2957_vm0, %v2956_v39  ;;  %2597 = vmatpush3.bf16.msra.mxu0 %v2821_v63 }
  0xda   :  { %2598 = vmatprep.subr.bf16.mxu0 %v2956_v39 }
  0xdd   :  { %2599 = vmatpush3.bf16.msra.mxu0 %v2822_v0 }
  0xde   :  { %2600 = vmatprep.subr.bf16.mxu0 %v2956_v39 }
  0xe1   :  { %2601 = vmatpush3.bf16.msra.mxu0 %v2823_v1 }
  0xe2   :  { %2602 = vmatprep.subr.bf16.mxu0 %v2956_v39 }
  0xe5   :  { %2603 = vmatpush3.bf16.msra.mxu0 %v2824_v2 }
  0xe6   :  { %2604 = vmatprep.subr.bf16.mxu0 %v2956_v39 }
  0xe9   :  { %2605 = vmatpush3.bf16.msra.mxu0 %v2825_v3  ;;  %v1615_v3 = vrot.slane %v1602_v32, %v1614_v62  ;;  %v2833_v32 = vld [vmem:[%s3384_s9 + $0x20] sm:$0xff]  }
  0xea   :  { %2606 = vmatprep.subr.bf16.mxu0 %v2956_v39 }
  0xed   :  { %2607 = vmatpush3.bf16.msra.mxu0 %v2826_v5 }
  0xee   :  { %2608 = vmatprep.subr.bf16.mxu0 %v2956_v39 }
  0xf1   :  { %2609 = vmatpush3.bf16.msra.mxu0 %v2827_v15 }
  0xf2   :  { %2610 = vmatprep.subr.bf16.mxu0 %v2956_v39 }
  0xf5   :  { %2611 = vmatpush3.bf16.msra.mxu0 %v2828_v16 }
 0x12b   :  { %v2364_v46 = vpop.f32.mrb[0].mxu0 }
 0x12c   :  { %v2386_v47 = vpop.f32.mrb[0].mxu1  ;;  %v2365_v48 = vpop.f32.mrb[1].mxu0 }
 0x12d   :  { %v2387_v49 = vpop.f32.mrb[1].mxu1  ;;  %v2366_v50 = vadd.f32 %v2365_v48, %v2364_v46  ;;  %v2367_v52 = vpop.f32.mrb[2].mxu0 }
 0x12e   :  { %v2388_v51 = vadd.f32 %v2387_v49, %v2386_v47  ;;  %v2389_v53 = vpop.f32.mrb[2].mxu1  ;;  %v2368_v55 = vpop.f32.mrb[3].mxu0 }
 0x12f   :  { %v2390_v56 = vpop.f32.mrb[3].mxu1 }
 0x130   :  { %v501_v58 = vadd.f32 %v2388_v51, %v2366_v50 }
 0x14b   :  { %v540_v4 = vpop.f32.mrb[4].mxu0 }
 0x14c   :  { %v541_v6 = vadd.f32 %v540_v4, %v501_v58  ;;  %v2594_v7 = vpop.f32.mrb[5].mxu0  ;;  %v2417_v8 = vpop.f32.mrb[4].mxu1 }
 0x14d   :  { %v543_v9 = vpop.f32.mrb[6].mxu0  ;;  %v2418_v10 = vpop.f32.mrb[5].mxu1 }
 0x14e   :  { %v2595_v11 = vpop.f32.mrb[7].mxu0  ;;  %v2419_v12 = vadd.f32 %v2418_v10, %v2417_v8  ;;  %v2420_v13 = vpop.f32.mrb[6].mxu1  ;;  %v1619_v34 = vadd.f32 %v1607_v33, %v541_v6  ;;  %v2834_v33 = vld [vmem:[%s3384_s9 + $0x28] sm:$0xff]  }
 0x14f   :  { %v2421_v14 = vpop.f32.mrb[7].mxu1 }
 0x150   :  { %v1622_v35 = vmin.f32 %v1619_v34, 20.0  ;;  %vm1646_vm1 = vcmp.gt.f32.partialorder %v1619_v34, 20.0 }
 0x152   :  { %v1625_v36 = vmul.f32 1.442695, %v1622_v35 }
 0x154   :  { %2839 = vpow2.f32 %v1625_v36 }
 0x15e   :  { %v2840_v47 = vpop.eup %2839 }
 0x15f   :  { %v1631_v50 = vadd.f32 2.0, %v2840_v47 }
 0x161   :  { %v1634_v56 = vmul.f32 %v2840_v47, %v1631_v50  ;;  %v2837_v50 = vld [vmem:[%s3386_s11 + $0x10] sm:$0xff]  }
 0x163   :  { %v1637_v57 = vadd.f32 2.0, %v1634_v56 }
 0x16b   :  { %v2439_v17 = vpop.f32.mrb[8].mxu0 }
 0x16c   :  { %v2440_v19 = vpop.f32.mrb[9].mxu0  ;;  %v2461_v20 = vpop.f32.mrb[8].mxu1 }
 0x16d   :  { %v2441_v21 = vadd.f32 %v2440_v19, %v2439_v17  ;;  %v2442_v22 = vpop.f32.mrb[10].mxu0  ;;  %v2462_v23 = vpop.f32.mrb[9].mxu1 }
 0x16e   :  { %v2443_v24 = vpop.f32.mrb[11].mxu0  ;;  %v2463_v25 = vadd.f32 %v2462_v23, %v2461_v20  ;;  %v2464_v26 = vpop.f32.mrb[10].mxu1 }
 0x16f   :  { %v1165_v27 = vadd.f32 %v2441_v21, %v2419_v12  ;;  %v2465_v28 = vpop.f32.mrb[11].mxu1 }
 0x170   :  { %v2829_v28 = vld [vmem:[%s3384_s9] sm:$0xff]  }
 0x171   :  { %v1205_v30 = vadd.f32 %v2463_v25, %v1165_v27 }
 0x18b   :  { %v2483_v38 = vpop.f32.mrb[12].mxu0 }
 0x18c   :  { %v2484_v40 = vpop.f32.mrb[13].mxu0  ;;  %v2505_v49 = vpop.f32.mrb[12].mxu1 }
 0x18d   :  { %v2485_v41 = vadd.f32 %v2484_v40, %v2483_v38  ;;  %v2486_v43 = vpop.f32.mrb[14].mxu0  ;;  %v2506_v52 = vpop.f32.mrb[13].mxu1  ;;  %v2309_v40 = vld [vmem:[%s3383_s8] ss:$0 sm:$0xff] }
 0x18e   :  { %v2487_v44 = vpop.f32.mrb[15].mxu0  ;;  %v2507_v53 = vadd.f32 %v2506_v52, %v2505_v49  ;;  %v2508_v54 = vpop.f32.mrb[14].mxu1  ;;  %v2836_v49 = vld [vmem:[%s3386_s11 + $0x8] sm:$0xff]   ;;  %v2334_v52 = vld [vmem:[%s3385_s10] ss:$0 sm:$0xff] }
 0x18f   :  { %v1245_v45 = vadd.f32 %v2485_v41, %v1205_v30  ;;  %v2509_v55 = vpop.f32.mrb[15].mxu1  ;;  %v2831_v30 = vld [vmem:[%s3384_s9 + $0x10] sm:$0xff]  }
 0x191   :  { %v1620_v46 = vadd.f32 %v1611_v42, %v1245_v45 }
 0x193   :  { %v1623_v48 = vmin.f32 %v1620_v46, 20.0  ;;  %vm1647_vm2 = vcmp.gt.f32.partialorder %v1620_v46, 20.0 }
 0x195   :  { %v1627_v51 = vmul.f32 1.442695, %v1623_v48  ;;  %v2835_v48 = vld [vmem:[%s3386_s11] sm:$0xff]  }
 0x197   :  { %2841 = vpow2.f32 %v1627_v51  ;;  %v2838_v51 = vld [vmem:[%s3386_s11 + $0x18] sm:$0xff]  }
 0x198   :  { %2843 = vrcp.f32 %v1637_v57 }
 0x1a1   :  { %v2842_v58 = vpop.eup %2841 }
 0x1a2   :  { %v1632_v59 = vadd.f32 2.0, %v2842_v58  ;;  %v2844_v63 = vpop.eup %2843 }
 0x1a3   :  { %v1643_v5 = vmul.f32 %v2844_v63, %v1634_v56 }
 0x1a4   :  { %v1635_v60 = vmul.f32 %v2842_v58, %v1632_v59 }
 0x1a5   :  { %v1649_v10 = vmul.f32 %v1643_v5, %v1619_v34 }
 0x1a6   :  { %v1638_v61 = vadd.f32 2.0, %v1635_v60 }
 0x1a7   :  { %v1652_v15 = vsel %vm1646_vm1, %v1619_v34, %v1649_v10 }
 0x1a8   :  { %2845 = vrcp.f32 %v1638_v61  ;;  %v1655_v18 = vpack.c.bf16 %v1652_v15, %v1652_v15 }
 0x1ab   :  { %v2527_v0 = vpop.f32.mrb[16].mxu0 }
 0x1ac   :  { %v2528_v1 = vpop.f32.mrb[17].mxu0 }
 0x1ad   :  { %v2529_v2 = vadd.f32 %v2528_v1, %v2527_v0  ;;  %v2530_v4 = vpop.f32.mrb[18].mxu0 }
 0x1ae   :  { %v2531_v6 = vpop.f32.mrb[19].mxu0  ;;  %v2342_v4 = vld [vmem:[%s3387_s12] ss:$0 sm:$0xff]  ;;  %s2923_s12 = scalar_lea.vmem %s2147_s24, 128 }
 0x1af   :  { %v1597_v7 = vadd.f32 %v2529_v2, %v2507_v53  ;;  %p2924_p10 = scmp.ne.s32.totalorder %s2147_s24, %s2923_s12  ;;  %p2929_p12 = scmp.lt.s32.totalorder %s2923_s12, %s2923_s12 }
 0x1b1   :  { %v1621_v8 = vadd.f32 %v1615_v3, %v1597_v7  ;;  %p2930_p13 = por %p2929_p12, %p2928_p11 }
 0x1b2   :  { %v2846_v9 = vpop.eup %2845 }
 0x1b3   :  { %v1624_v11 = vmin.f32 %v1621_v8, 20.0  ;;  %v1644_v12 = vmul.f32 %v2846_v9, %v1635_v60  ;;  %vm1648_vm3 = vcmp.gt.f32.partialorder %v1621_v8, 20.0  ;;  %p2931_p0 = pnand %p2930_p13, %p2924_p10 }
 0x1b5   :  { %v1629_v13 = vmul.f32 1.442695, %v1624_v11  ;;  %v1650_v14 = vmul.f32 %v1644_v12, %v1620_v46 }
 0x1b7   :  { %2847 = vpow2.f32 %v1629_v13  ;;  %v1653_v16 = vsel %vm1647_vm2, %v1620_v46, %v1650_v14 }
 0x1b8   :  { %v1656_v17 = vpack.c.bf16 %v1653_v16, %v1653_v16 }
 0x1ba   :  { %1889 = vmatprep.mubr.bf16.mxu1 %v1656_v17 }
 0x1bb   :  { %1890 = vmatmul.mubr.bf16.vlgmr.msra.gmra.mrb[16].mxu1 %v1655_v18 }
 0x1bc   :  { %2628 = vmatprep.mubr.msk.bf16.mxu1 %vm2957_vm0, %v2956_v39  ;;  %2617 = vmatpush3.bf16.msra.mxu1 %v2829_v28 }
 0x1bd   :  { %2618 = vmatprep.subr.bf16.mxu1 %v2956_v39 }
 0x1c0   :  { %2619 = vmatpush3.bf16.msra.mxu1 %v2830_v29 }
 0x1c1   :  { %v2848_v19 = vpop.eup %2847  ;;  %2620 = vmatprep.subr.bf16.mxu1 %v2956_v39 }
 0x1c2   :  { %v1633_v20 = vadd.f32 2.0, %v2848_v19 }
 0x1c4   :  { %v1636_v21 = vmul.f32 %v2848_v19, %v1633_v20  ;;  %2621 = vmatpush3.bf16.msra.mxu1 %v2831_v30 }
 0x1c5   :  { %2622 = vmatprep.subr.bf16.mxu1 %v2956_v39 }
 0x1c6   :  { %v1639_v22 = vadd.f32 2.0, %v1636_v21 }
 0x1c8   :  { %2849 = vrcp.f32 %v1639_v22  ;;  %2623 = vmatpush3.bf16.msra.mxu1 %v2832_v31 }
 0x1c9   :  { %2624 = vmatprep.subr.bf16.mxu1 %v2956_v39 }
 0x1cc   :  { %2625 = vmatpush3.bf16.msra.mxu1 %v2833_v32 }
 0x1cd   :  { %2626 = vmatprep.subr.bf16.mxu1 %v2956_v39 }
 0x1d0   :  { %2627 = vmatpush3.bf16.msra.mxu1 %v2834_v33 }
 0x1d1   :  { %2632 = vmatprep.subr.bf16.mxu1 %v2956_v39 }
 0x1d2   :  { %v2850_v23 = vpop.eup %2849 }
 0x1d3   :  { %v1645_v24 = vmul.f32 %v2850_v23, %v1636_v21 }
 0x1d5   :  { %v1651_v25 = vmul.f32 %v1645_v24, %v1621_v8 }
 0x1d7   :  { %v1654_v26 = vsel %vm1648_vm3, %v1621_v8, %v1651_v25 }
 0x1d8   :  { %v1657_v27 = vpack.c.bf16 %v1654_v26, %v1654_v26 }
 0x1da   :  { %2613 = vmatmul.mubr.bf16.vlgmr.msra.gmra.mrb[20].mxu0 %v1657_v27 }
 0x28e   :  { %v2549_v34 = vpop.f32.mrb[16].mxu1 }
 0x28f   :  { %v2550_v35 = vpop.f32.mrb[17].mxu1 }
 0x290   :  { %v2551_v36 = vadd.f32 %v2550_v35, %v2549_v34  ;;  %v2552_v37 = vpop.f32.mrb[18].mxu1 }
 0x291   :  { %v2553_v38 = vpop.f32.mrb[19].mxu1 }
 0x292   :  { %v1892_v41 = vadd.f32 %v2551_v36, %v2309_v40 }
 0x2ad   :  { %v1931_v42 = vpop.f32.mrb[20].mxu0 }
 0x2ae   :  { %v1932_v43 = vadd.f32 %v1931_v42, %v1892_v41  ;;  %v2614_v44 = vpop.f32.mrb[21].mxu0 }
 0x2af   :  { %v1934_v45 = vpop.f32.mrb[22].mxu0 }
 0x2b0   :  { %v1937_v46 = vpack.c.bf16 %v1932_v43, %v1932_v43  ;;  %v2615_v47 = vpop.f32.mrb[23].mxu0 }
 0x2b2   :  { %2629 = vmatmul.mubr.msk.bf16.vlgmr.msra.gmra.mrb[20].mxu1 %vm1993_vm4, %v1937_v46 }
 0x2b3   :  { %2640 = vmatprep.mubr.msk.bf16.mxu1 %vm2957_vm0, %v2956_v39  ;;  %2633 = vmatpush3.bf16.msra.mxu1 %v2835_v48 }
 0x2b4   :  { %2634 = vmatprep.subr.bf16.mxu1 %v2956_v39 }
 0x2b7   :  { %2635 = vmatpush3.bf16.msra.mxu1 %v2836_v49 }
 0x2b8   :  { %2636 = vmatprep.subr.bf16.mxu1 %v2956_v39 }
 0x2bb   :  { %2637 = vmatpush3.bf16.msra.mxu1 %v2837_v50 }
 0x2bc   :  { %2638 = vmatprep.subr.bf16.mxu1 %v2956_v39 }
 0x2bf   :  { %2639 = vmatpush3.bf16.msra.mxu1 %v2838_v51 }
 0x385   :  { %v2031_v53 = vpop.f32.mrb[20].mxu1 }
 0x386   :  { %v2032_v54 = vadd.f32 %v2334_v52, %v2031_v53  ;;  %v2630_v55 = vpop.f32.mrb[21].mxu1 }
 0x387   :  { %v2034_v56 = vpop.f32.mrb[22].mxu1 }
 0x388   :  { %v2037_v57 = vmin.f32 %v2032_v54, 20.0  ;;  %v2631_v58 = vpop.f32.mrb[23].mxu1  ;;  %vm2045_vm5 = vcmp.gt.f32.partialorder %v2032_v54, 20.0 }
 0x38a   :  { %v2038_v59 = vmul.f32 1.442695, %v2037_v57 }
 0x38c   :  { %2851 = vpow2.f32 %v2038_v59 }
 0x396   :  { %v2852_v60 = vpop.eup %2851 }
 0x397   :  { %v2040_v61 = vadd.f32 2.0, %v2852_v60 }
 0x399   :  { %v2041_v39 = vmul.f32 %v2852_v60, %v2040_v61 }
 0x39b   :  { %v2042_v62 = vadd.f32 2.0, %v2041_v39 }
 0x39d   :  { %2853 = vrcp.f32 %v2042_v62 }
 0x3a7   :  { %v2854_v63 = vpop.eup %2853 }
 0x3a8   :  { %v2044_v0 = vmul.f32 %v2854_v63, %v2041_v39 }
 0x3aa   :  { %v2046_v1 = vmul.f32 %v2044_v0, %v2032_v54 }
 0x3ac   :  { %v2047_v2 = vsel %vm2045_vm5, %v2032_v54, %v2046_v1 }
 0x3ad   :  { %v2048_v3 = vpack.c.bf16 %v2047_v2, %v2047_v2 }
 0x3af   :  { %2641 = vmatmul.mubr.msk.bf16.vlgmr.msra.gmra.mrb[24].mxu1 %vm2088_vm6, %v2048_v3 }
 0x482   :  { %v2126_v5 = vpop.f32.mrb[24].mxu1 }
 0x483   :  { %v2127_v6 = vadd.f32 %v2342_v4, %v2126_v5  ;;  %v2642_v7 = vpop.f32.mrb[25].mxu1 }
 0x484   :  { %v2129_v8 = vpop.f32.mrb[26].mxu1 }
 0x485   :  { %v2643_v9 = vpop.f32.mrb[27].mxu1  ;;  %v2132_v10 = vmul.f32 %v2127_v6, %v2127_v6 }
 0x487   :  { %v2133_v11 = vsel %vm2088_vm6, %v2132_v10, 0.0 }
 0x488   :  { %2134 = vadd.xlane.f32.xlu0 %v2133_v11 }
 0x515   :  { %v2135_v12 = vpop.xlane.xlu0 %2134 }
 0x516   :  { %v2136_v13 = vmax.f32 %v2135_v12, 1e-24 }
 0x518   :  { %2855 = vrsqrt.f32 %v2136_v13 }
 0x522   :  { %v2856_v14 = vpop.eup %2855 }
 0x523   :  { %v2138_v15 = vmul.f32 %v2856_v14, %v2127_v6 }
 0x525   :  { %2139 = vst.msk [vmem:[#allocation8] sm:$0xff] %vm2088_vm6, %v2138_v15 }
 0x526   :  { %2934 = shalt.err (!%p2931_p0)
}
 0x527   :  { %s2935_s27 = scalar_lea.hbm %s3388_s13, 128 }
 0x528   :  { %p2936_p1 = scmp.ne.s32.totalorder %s3388_s13, %s2935_s27  ;;  %p2939_p2 = scmp.lt.u32.totalorder %s2935_s27, %s3388_s13 }
 0x52a   :  { %p2941_p3 = pnand %p2939_p2, %p2936_p1 }
 0x52c   :  { %2944 = shalt.err (!%p2941_p3)
}
 0x52d   :  { %2149 = dma.vmem_to_hbm [thread:$0]  %s2147_s24, 128, %s3388_s13, [#allocation4]  }
 0x52e   :  { %2949 = dma.done.wait [#allocation4], 128  }
 0x52f   :  { %2950 = vsyncadd [#allocation4], 4294967168 }
 0x530   :  { %2153 = vsyncpa [#allocation3], 1 }
 0x531   :  { %2154 = vsyncpa [#allocation6], 1 }
 0x532   :  { %2155 = vsyncpa [#allocation4], 1 }

</bundles_post_ra>
